<compile_context>
chip_gen: v5e
topology: v5e:2x2
jax: 0.10.0
libtpu: 0.0.40
codegen_flags: <defaults>
</compile_context>

<pallas_src>
import functools

import jax
import jax.numpy as jnp
from jax import lax
from jax.experimental import pallas as pl
from jax.experimental.pallas import tpu as pltpu

# Deterministic instantiation of losses_and_weights (weight -> loss):
#   1.0 -> MSE (mean reduction), 0.5 -> L1 (mean reduction)
W_MSE = 1.0
W_L1 = 0.5

LANES = 128
MAX_TILE_ROWS = 4096          # 2 MiB/input/step -> 8 MiB double-buffered
SINGLE_STEP_MAX_ROWS = 4096   # <= 2 MiB/input: one block, no grid machinery
CHUNK_ROWS = 128              # in-kernel accumulation chunk (16 vregs of f32)
ROW_ALIGN = 256               # tile_rows granularity (mult of 32: all dtypes)
NCORES = 2                    # v7x megacore split; harmless on 1-TC chips


def _ceil_div(a, b):
    return -(-a // b)


def _round_up(a, b):
    return _ceil_div(a, b) * b


def _weighted_term(p, t):
    d = p.astype(jnp.float32) - t.astype(jnp.float32)
    return W_MSE * (d * d) + W_L1 * jnp.abs(d)


def _chunked_partial_sums(pred_ref, targ_ref, rows, chunk_rows):
    """Sum the fused weighted loss term over `rows` rows onto an (8,128) acc.

    Live ranges stay at a few vregs per chunk; summing over the leading axis
    of the (chunk//8, 8, 128) view is pure elementwise VPU adds (no XLU work
    inside the loop).
    """
    n_chunks = rows // chunk_rows

    def body(c, acc):
        r = c * chunk_rows
        term = _weighted_term(pred_ref[pl.ds(r, chunk_rows), :],
                              targ_ref[pl.ds(r, chunk_rows), :])
        return acc + term.reshape(chunk_rows // 8, 8, LANES).sum(axis=0)

    init = jnp.zeros((8, LANES), jnp.float32)
    return lax.fori_loop(0, n_chunks, body, init, unroll=True)


def _basic_loss_single_block_kernel(pred_ref, targ_ref, out_ref, *, inv_n,
                                    chunk_rows):
    """Whole (padded) tensor in one block; scalar result written to SMEM."""
    acc = _chunked_partial_sums(pred_ref, targ_ref, pred_ref.shape[0],
                                chunk_rows)
    out_ref[0, 0] = jnp.sum(acc) * inv_n


def _basic_loss_tiled_kernel(pred_ref, targ_ref, out_ref):
    """Streaming path: per-core resident (8,128) output block as accumulator."""
    i = pl.program_id(1)          # "arbitrary" reduction axis

    @pl.when(i == 0)
    def _init():
        out_ref[...] = jnp.zeros_like(out_ref)

    out_ref[...] += _chunked_partial_sums(pred_ref, targ_ref,
                                          pred_ref.shape[0], CHUNK_ROWS)


def _pad_to_rows(x, rows_padded):
    """Flatten and zero-pad to rows_padded*128 elements, reshape lane-dense."""
    flat = x.reshape(-1)
    pad = rows_padded * LANES - flat.shape[0]
    if pad:
        flat = jnp.pad(flat, (0, pad))   # zeros in BOTH tensors -> d == 0 tail
    return flat.reshape(rows_padded, LANES)


def basic_loss(pred, target):
    assert pred.shape == target.shape, "pred/target shape mismatch"
    assert pred.dtype == target.dtype, "pred/target dtype mismatch"
    n_elems = pred.size
    inv_n = 1.0 / float(n_elems)

    # Sublane packing: f32 -> 8 rows, bf16 -> 16, int8/fp8 -> 32.
    sub_mult = max(8, 32 // pred.dtype.itemsize)
    rows = _ceil_div(n_elems, LANES)

    if rows <= SINGLE_STEP_MAX_ROWS:
        # Small/medium input (e.g. the shipped (2,4,16,16) = 16 rows): one grid
        # step, no accumulator, SMEM scalar output.
        rows_p = _round_up(rows, sub_mult)
        pred2d = _pad_to_rows(pred, rows_p)
        targ2d = _pad_to_rows(target, rows_p)
        chunk = next(c for c in (CHUNK_ROWS, 64, 32, 16, 8)
                     if c >= sub_mult and rows_p % c == 0)
        kernel = functools.partial(_basic_loss_single_block_kernel,
                                   inv_n=inv_n, chunk_rows=chunk)
        out = pl.pallas_call(
            kernel,
            out_shape=jax.ShapeDtypeStruct((1, 1), jnp.float32),
            grid=(1,),
            in_specs=[
                pl.BlockSpec((rows_p, LANES), lambda i: (0, 0)),
                pl.BlockSpec((rows_p, LANES), lambda i: (0, 0)),
            ],
            out_specs=pl.BlockSpec(memory_space=pltpu.MemorySpace.SMEM),
            compiler_params=pltpu.CompilerParams(
                dimension_semantics=("arbitrary",),
            ),
        )(pred2d, targ2d)
        return out[0, 0]

    # Large input: split rows across NCORES "parallel" slots (both TensorCores
    # on v7x), stream big tiles along the "arbitrary" reduction axis.
    half_rows = _ceil_div(rows, NCORES)
    steps = max(1, _ceil_div(half_rows, MAX_TILE_ROWS))
    tile_rows = _round_up(_ceil_div(half_rows, steps), ROW_ALIGN)
    rows_p = NCORES * steps * tile_rows          # pad waste <= NCORES*steps*256 rows

    pred2d = _pad_to_rows(pred, rows_p)
    targ2d = _pad_to_rows(target, rows_p)

    in_spec = pl.BlockSpec((tile_rows, LANES),
                           lambda c, i: (c * steps + i, 0))
    out = pl.pallas_call(
        _basic_loss_tiled_kernel,
        out_shape=jax.ShapeDtypeStruct((NCORES * 8, LANES), jnp.float32),
        grid=(NCORES, steps),
        in_specs=[in_spec, in_spec],
        out_specs=pl.BlockSpec((8, LANES), lambda c, i: (c, 0)),
        compiler_params=pltpu.CompilerParams(
            dimension_semantics=("parallel", "arbitrary"),
            vmem_limit_bytes=32 * 1024 * 1024,
        ),
    )(pred2d, targ2d)
    # Combine the per-core / per-lane partial sums (tiny 8 KiB XLA reduce).
    return jnp.sum(out) * inv_n


def basic_loss_ref(pred, target):
    d = pred.astype(jnp.float32) - target.astype(jnp.float32)
    return W_MSE * jnp.mean(d * d) + W_L1 * jnp.mean(jnp.abs(d))


if __name__ == "__main__":
    key = jax.random.PRNGKey(0)
    ks = jax.random.split(key, 8)

    # 1) Shipped shape (NCHW), exercises the single-block fast path.
    pred = jax.random.normal(ks[0], (2, 4, 16, 16), dtype=jnp.float32)
    target = jax.random.normal(ks[1], (2, 4, 16, 16), dtype=jnp.float32)
    loss = jax.block_until_ready(basic_loss(pred, target))
    ref = jax.block_until_ready(basic_loss_ref(pred, target))
    assert jnp.allclose(loss, ref, rtol=1e-4, atol=1e-5), (loss, ref)

    # 2) Ragged shape: exercises zero-padding (tail contributes exactly 0).
    pred_r = jax.random.normal(ks[2], (3, 5, 33, 35), dtype=jnp.float32)
    target_r = jax.random.normal(ks[3], (3, 5, 33, 35), dtype=jnp.float32)
    loss_r = jax.block_until_ready(basic_loss(pred_r, target_r))
    ref_r = jax.block_until_ready(basic_loss_ref(pred_r, target_r))
    assert jnp.allclose(loss_r, ref_r, rtol=1e-4, atol=1e-5), (loss_r, ref_r)

    # 3) bf16 inputs fed un-upcast (HBM traffic halved; kernel upcasts on-chip).
    pred_b = jax.random.normal(ks[4], (2, 4, 16, 16), dtype=jnp.bfloat16)
    target_b = jax.random.normal(ks[5], (2, 4, 16, 16), dtype=jnp.bfloat16)
    loss_b = jax.block_until_ready(basic_loss(pred_b, target_b))
    ref_b = jax.block_until_ready(basic_loss_ref(pred_b, target_b))
    assert jnp.allclose(loss_b, ref_b, rtol=1e-3, atol=1e-3), (loss_b, ref_b)

    # 4) Larger shape: tiled 2-slot parallel path with multi-step accumulation.
    pred_l = jax.random.normal(ks[6], (4, 16, 128, 160), dtype=jnp.float32)
    target_l = jax.random.normal(ks[7], (4, 16, 128, 160), dtype=jnp.float32)
    loss_l = jax.block_until_ready(basic_loss(pred_l, target_l))
    ref_l = jax.block_until_ready(basic_loss_ref(pred_l, target_l))
    assert jnp.allclose(loss_l, ref_l, rtol=1e-4, atol=1e-5), (loss_l, ref_l)

    print("KERNEL_OK")
</pallas_src>

<mosaic_0001>
module attributes {stable_mosaic.version = 11 : i64} {
  func.func @_basic_loss_single_block_kernel(%arg0: i32, %arg1: memref<16x128xf32, #tpu.memory_space<vmem>>, %arg2: memref<16x128xf32, #tpu.memory_space<vmem>>, %arg3: memref<1x1xf32, #tpu.memory_space<smem>>) attributes {dimension_semantics = [#tpu.dimension_semantics<arbitrary>], iteration_bounds = array<i64: 1>, scalar_prefetch = 0 : i64, scratch_operands = 0 : i64, tpu.core_type = #tpu.core_type<tc>, window_params = [{pipeline_mode = #tpu.pipeline_mode<synchronous>, transform_indices = @transform_0, window_bounds = array<i64: 16, 128>}, {pipeline_mode = #tpu.pipeline_mode<synchronous>, transform_indices = @transform_1, window_bounds = array<i64: 16, 128>}, {transform_indices = @transform_2, window_bounds = array<i64: 1, 1>}]} {
    %cst = arith.constant 0.000000e+00 : f32
    %0 = vector.broadcast %cst : f32 to vector<8x128xf32>
    %c0_i32 = arith.constant 0 : i32
    %c16_i32 = arith.constant 16 : i32
    %1 = arith.muli %c0_i32, %c16_i32 : i32
    %2 = arith.index_cast %1 : i32 to index
    %c0 = arith.constant 0 : index
    %3 = vector.load %arg1[%2, %c0] : memref<16x128xf32, #tpu.memory_space<vmem>>, vector<16x128xf32>
    %4 = arith.index_cast %1 : i32 to index
    %c0_0 = arith.constant 0 : index
    %5 = vector.load %arg2[%4, %c0_0] : memref<16x128xf32, #tpu.memory_space<vmem>>, vector<16x128xf32>
    %6 = arith.subf %3, %5 : vector<16x128xf32>
    %7 = arith.mulf %6, %6 : vector<16x128xf32>
    %cst_1 = arith.constant 1.000000e+00 : f32
    %8 = vector.broadcast %cst_1 : f32 to vector<16x128xf32>
    %9 = arith.mulf %8, %7 : vector<16x128xf32>
    %10 = math.absf %6 : vector<16x128xf32>
    %cst_2 = arith.constant 5.000000e-01 : f32
    %11 = vector.broadcast %cst_2 : f32 to vector<16x128xf32>
    %12 = arith.mulf %11, %10 : vector<16x128xf32>
    %13 = arith.addf %9, %12 : vector<16x128xf32>
    %14 = vector.shape_cast %13 : vector<16x128xf32> to vector<2x8x128xf32>
    %cst_3 = arith.constant dense<0.000000e+00> : vector<8x128xf32>
    %15 = vector.multi_reduction <add>, %14, %cst_3 [0] : vector<2x8x128xf32> to vector<8x128xf32>
    %16 = arith.addf %0, %15 : vector<8x128xf32>
    %c1_i32 = arith.constant 1 : i32
    %17 = vector.shape_cast %16 : vector<8x128xf32> to vector<1x8x128xf32>
    %cst_4 = arith.constant dense<0.000000e+00> : vector<1xf32>
    %18 = vector.multi_reduction <add>, %17, %cst_4 [1, 2] : vector<1x8x128xf32> to vector<1xf32>
    %19 = vector.shape_cast %18 : vector<1xf32> to vector<1x1x1xf32>
    %20 = vector.extract %19[0, 0, 0] : f32 from vector<1x1x1xf32>
    %cst_5 = arith.constant 4.8828125E-4 : f32
    %21 = arith.mulf %20, %cst_5 : f32
    %c0_6 = arith.constant 0 : index
    %c0_7 = arith.constant 0 : index
    %22 = memref.load %arg3[%c0_6, %c0_7] : memref<1x1xf32, #tpu.memory_space<smem>>
    memref.store %21, %arg3[%c0_6, %c0_7] : memref<1x1xf32, #tpu.memory_space<smem>>
    return
  }
  func.func @transform_0(%arg0: i32) -> (i32, i32) {
    %c0_i32 = arith.constant 0 : i32
    %c0_i32_0 = arith.constant 0 : i32
    %c0_i32_1 = arith.constant 0 : i32
    return %c0_i32, %c0_i32_0 : i32, i32
  }
  func.func @transform_1(%arg0: i32) -> (i32, i32) {
    %c0_i32 = arith.constant 0 : i32
    %c0_i32_0 = arith.constant 0 : i32
    %c0_i32_1 = arith.constant 0 : i32
    return %c0_i32, %c0_i32_0 : i32, i32
  }
  func.func @transform_2(%arg0: i32) -> (i32, i32) {
    %c0_i32 = arith.constant 0 : i32
    %c0_i32_0 = arith.constant 0 : i32
    %c0_i32_1 = arith.constant 0 : i32
    return %c0_i32, %c0_i32_0 : i32, i32
  }
}

</mosaic_0001>

<bundles_post_ra>
// kernel: tpu_custom_call.1
= control target key start
LH: loop header
LB: loop body
LE: loop exit
PB: predicated region body
PF: predicated region fallthrough
CT: control target
= control target key end

     0   :  { %7 = vsyncpa [#allocation3], 0  ;;  %s191_s0 = inlined_call_operand.hbm [shape: f32[16,128], index: 0, kind: input, shape index: {}]   ;;  %s192_s1 = inlined_call_operand.hbm [shape: f32[16,128], index: 1, kind: input, shape index: {}]   ;;  %s193_s2 = inlined_call_operand.hbm [shape: f32[1,1], index: 2, kind: output, shape index: {}]  }
   0x1   :  { %8 = vsyncpa [#allocation6], 0 }
   0x2   :  { %9 = vsyncpa [#allocation4], 0  ;;  %s14_s11 = sshll.u32 %s191_s0, 4  ;;  %s162_s12 = smov [#allocation2]   ;;  %s15_s11 = int_to_ptr.hbm [resolvable:$true] %s14_s11 }
   0x3   :  { %s16_s13 = sshll.u32 %s162_s12, 4  ;;  %s27_s16 = sshll.u32 %s192_s1, 4  ;;  %s17_s13 = int_to_ptr.vmem [resolvable:$true] %s16_s13  ;;  %s28_s16 = int_to_ptr.hbm [resolvable:$true] %s27_s16 }
   0x4   :  { %s163_s17 = smov 128   ;;  %s164_s18 = smov 8  }
   0x5   :  { %22 = dma.hbm_to_vmem [thread:$0]  %s15_s11, 256, %s17_s13, [#allocation3], %s163_s17, %s163_s17, %s164_s18  }
   0x6   :  { %s165_s19 = smov [#allocation5]  }
   0x7   :  { %s29_s20 = sshll.u32 %s165_s19, 4  ;;  %s30_s20 = int_to_ptr.vmem [resolvable:$true] %s29_s20 }
   0x8   :  { %35 = dma.hbm_to_vmem [thread:$0]  %s28_s16, 256, %s30_s20, [#allocation6], %s163_s17, %s163_s17, %s164_s18  }
   0x9   :  { %156 = dma.done.wait [#allocation3], 256  }
   0xa   :  { %157 = vsyncadd [#allocation3], 4294967040 }
   0xb   :  { %158 = dma.done.wait [#allocation6], 256  }
   0xc   :  { %159 = vsyncadd [#allocation6], 4294967040  ;;  %v44_v0 = vld [vmem:[#allocation2] sm:$0xff]  ;;  %v45_v1 = vld [vmem:[#allocation2 + $0x8] sm:$0xff]  ;;  %s77_s21 = sshll.u32 %s193_s2, 4  ;;  %s166_s24 = smov [#allocation7]   ;;  %s78_s21 = int_to_ptr.hbm [resolvable:$true] %s77_s21 }
   0xd   :  { %v46_v2 = vld [vmem:[#allocation5] sm:$0xff]  ;;  %v47_v3 = vld [vmem:[#allocation5 + $0x8] sm:$0xff] }
   0xe   :  { %v48_v4 = vsub.f32 %v44_v0, %v46_v2  ;;  %v49_v5 = vsub.f32 %v45_v1, %v47_v3 }
  0x10   :  { %v50_v6 = vmul.f32 %v48_v4, %v48_v4  ;;  %v52_v7 = vand.u32 2147483647, %v48_v4  ;;  %v51_v8 = vmul.f32 %v49_v5, %v49_v5  ;;  %v53_v9 = vand.u32 2147483647, %v49_v5 }
  0x12   :  { %v54_v10 = vmul.f32 0.5, %v52_v7  ;;  %v55_v11 = vmul.f32 0.5, %v53_v9 }
  0x14   :  { %v56_v12 = vadd.f32 %v54_v10, %v50_v6  ;;  %v57_v13 = vadd.f32 %v55_v11, %v51_v8 }
  0x16   :  { %v58_v14 = vadd.f32 %v57_v13, %v56_v12 }
  0x18   :  { %60 = vadd.xlane.f32.xlu0 %v58_v14 }
  0x8b   :  { %v61_v15 = vpop.xlane.xlu0 %60 }
  0x8c   :  { %v62_v16 = vrot.slane %v61_v15, 4 }
  0x8e   :  { %v63_v17 = vadd.f32 %v62_v16, %v61_v15 }
  0x90   :  { %v64_v18 = vrot.slane %v63_v17, 2 }
  0x92   :  { %v65_v19 = vadd.f32 %v64_v18, %v63_v17 }
  0x94   :  { %v66_v20 = vrot.slane %v65_v19, 1 }
  0x96   :  { %v67_v21 = vadd.f32 %v66_v20, %v65_v19 }
  0x98   :  { %89 = vpush %v67_v21 }
  0xc9   :  { %s90_s22 = spop %89 }
  0xca   :  { %s69_s23 = smul.f32 0.00048828125, %s90_s22 }
  0xcc   :  { %71 = sst [smem:[#allocation7]] %s69_s23 }
  0xcd   :  { %80 = dma.smem_to_hbm %s166_s24, 16, %s78_s21, [#allocation4]  }
  0xce   :  { %160 = dma.done.wait [#allocation4], 16  }
  0xcf   :  { %161 = vsyncadd [#allocation4], 4294967280 }
  0xd0   :  { %85 = sfence }
  0xd1   :  { %86 = vsyncpa [#allocation3], 1 }
  0xd2   :  { %87 = vsyncpa [#allocation6], 1 }
  0xd3   :  { %88 = vsyncpa [#allocation4], 1 }

</bundles_post_ra>
